<compile_context>
chip_gen: v6e
topology: v6e:2x2x1
jax: 0.10.0
libtpu: 0.0.40
codegen_flags: <defaults>
</compile_context>

<pallas_src>
import functools

import jax
import jax.numpy as jnp
from jax.experimental import pallas as pl
from jax.experimental.pallas import tpu as pltpu


_TAPS = tuple((dy, dx) for dy in range(3) for dx in range(3))   # tap index t = dy*3 + dx


def _basic_block_kernel(x_ref, w1_ref, b1_ref, w2_ref, b2_ref, *out_refs,
                        H, W, with_det):
    """Fused conv1+BN1+ReLU -> conv2+BN2 -> {ReLU(z)+x, z+x} for B_blk images.

    x_ref   : (B_blk, C, H*W)  input block, C in sublanes, H*W lane-dense
    w*_ref  : (9, Cout, Cin)   per-tap conv weights with BN scale folded
    b*_ref  : (Cout, 1)        folded BN bias (f32)
    out_refs: out (and optionally det), each (B_blk, C, H*W)
    """
    out_ref = out_refs[0]
    det_ref = out_refs[1] if with_det else None
    B_blk, C, HW = x_ref.shape
    assert HW == H * W

    # Boundary-validity masks for the 3x3 SAME-padding taps, generated in-kernel
    # (no HBM mask input).  pltpu.roll wraps around the flat H*W axis; the wrapped
    # lanes are exactly the ones these masks zero out.
    lane = jax.lax.broadcasted_iota(jnp.int32, (1, HW), 1)
    col = lane % W
    top_ok = lane >= W                    # dy == 0 tap valid (row >= 1)
    bot_ok = lane < (HW - W)              # dy == 2 tap valid (row <= H-2)
    left_ok = col >= 1                    # dx == 0 tap valid (col >= 1)
    right_ok = col <= (W - 2)             # dx == 2 tap valid (col <= W-2)
    row_m = (top_ok, None, bot_ok)
    col_m = (left_ok, None, right_ok)
    masks = []
    for dy, dx in _TAPS:
        rm, cm = row_m[dy], col_m[dx]
        if rm is None:
            masks.append(cm)              # may be None for the center tap
        elif cm is None:
            masks.append(rm)
        else:
            masks.append(jnp.logical_and(rm, cm))

    # Weights/bias loaded once per grid step, reused for all B_blk images.
    w1 = w1_ref[...]                      # (9, C, C), MXU dtype (bf16 or f32)
    w2 = w2_ref[...]
    b1 = b1_ref[...]                      # (C, 1) f32
    b2 = b2_ref[...]

    def conv3x3(v32, w):
        """v32: (Cin, HW) f32 -> f32 (Cout, HW); 3x3, stride 1, SAME padding."""
        acc = None
        for t, (dy, dx) in enumerate(_TAPS):
            shift = ((1 - dy) * W + (1 - dx)) % HW      # result[i] = v[i + (dy-1)*W + (dx-1)]
            tap = pltpu.roll(v32, shift, 1) if shift else v32   # XLU lane rotate (idle slot)
            if masks[t] is not None:
                tap = jnp.where(masks[t], tap, 0.0)
            part = jnp.dot(w[t], tap.astype(w.dtype),
                           preferred_element_type=jnp.float32)  # f32 accumulate on MXU
            acc = part if acc is None else acc + part
        return acc

    for b in range(B_blk):
        xf = x_ref[b].astype(jnp.float32)                        # (C, HW)
        # conv1 + BN1 + ReLU
        h = jnp.maximum(conv3x3(xf, w1) + b1, 0.0)
        # conv2 + BN2 (ConvBlock last=True -> no activation)
        z = conv3x3(h, w2) + b2
        out_ref[b] = (jnp.maximum(z, 0.0) + xf).astype(out_ref.dtype)   # ReLU(z) + shortcut
        if with_det:
            det_ref[b] = (z + xf).astype(det_ref.dtype)                 # detached feature


def _pick_batch_block(n, c, hw, itemsize, budget_bytes=8 << 20):
    """Largest divisor of n whose x-block fits the budget, keeping >=2 grid steps (v7x)."""
    per_img = max(1, c * hw * itemsize)
    best = 1
    for d in range(1, n + 1):
        if n % d:
            continue
        if d * per_img > budget_bytes:
            continue
        if n >= 2 and n // d < 2:
            continue
        best = d
    return best


def basic_block_fused(x_nchw, params, *, compute_dtype=jnp.bfloat16, with_det=True):
    """Fused BasicBlock forward.  Returns (out, det); det is None if with_det=False."""
    N, C, H, W = x_nchw.shape
    HW = H * W
    cd = jnp.dtype(compute_dtype)

    # NCHW -> (N, C, H*W) is a free reshape (no HBM transpose); H*W is lane-dense.
    xf = x_nchw.reshape(N, C, HW).astype(cd)

    def fold(w_hwio, bn_scale):
        # (3,3,Cin,Cout) -> (9, Cout, Cin), BN scale folded along Cout; tap = dy*3+dx.
        cin, cout = w_hwio.shape[2], w_hwio.shape[3]
        w = w_hwio * bn_scale[None, None, None, :]
        return jnp.transpose(w, (0, 1, 3, 2)).reshape(9, cout, cin).astype(cd)

    w1 = fold(params["w1"], params["bn1_scale"])
    w2 = fold(params["w2"], params["bn2_scale"])
    b1 = params["bn1_bias"].reshape(C, 1).astype(jnp.float32)
    b2 = params["bn2_bias"].reshape(C, 1).astype(jnp.float32)

    B_blk = _pick_batch_block(N, C, HW, cd.itemsize)
    grid = (N // B_blk,)
    n_out = 2 if with_det else 1

    blk_bytes = B_blk * C * HW * cd.itemsize
    # double-buffered in/out blocks + f32 working set; clamp to a v7x-safe (64 MiB) budget.
    vmem_limit = int(min(48 << 20, max(32 << 20, (2 + 2 * n_out) * blk_bytes + (8 << 20))))

    kernel = functools.partial(_basic_block_kernel, H=H, W=W, with_det=with_det)

    data_spec = pl.BlockSpec((B_blk, C, HW), lambda n: (n, 0, 0))
    w_spec = pl.BlockSpec((9, C, C), lambda n: (0, 0, 0))
    b_spec = pl.BlockSpec((C, 1), lambda n: (0, 0))

    flops = 2 * (2 * N * HW * C * 9 * C)
    bytes_accessed = int(cd.itemsize * (xf.size + n_out * N * C * HW + w1.size + w2.size)
                         + 4 * (b1.size + b2.size))

    outs = pl.pallas_call(
        kernel,
        out_shape=tuple(jax.ShapeDtypeStruct((N, C, HW), cd) for _ in range(n_out)),
        grid_spec=pltpu.PrefetchScalarGridSpec(
            num_scalar_prefetch=0,
            grid=grid,
            in_specs=[data_spec, w_spec, b_spec, w_spec, b_spec],
            out_specs=tuple(data_spec for _ in range(n_out)),
        ),
        compiler_params=pltpu.CompilerParams(
            dimension_semantics=("parallel",),          # batch blocks -> both TCs on v7x
            vmem_limit_bytes=vmem_limit),
        cost_estimate=pl.CostEstimate(flops=flops, transcendentals=0,
                                      bytes_accessed=bytes_accessed),
    )(xf, w1, b1, w2, b2)

    out = outs[0].reshape(N, C, H, W)
    det = outs[1].reshape(N, C, H, W) if with_det else None
    return out, det


def basic_block_forward(params, input_list, *, compute_dtype=jnp.bfloat16):
    """JAX/Pallas equivalent of BasicBlock.forward([x, features, get_features, detached])."""
    x, features, get_features, detached = input_list
    # TODO(synk): kwinner (Sparsify2D_all) gating branch not implemented (kwinner=False default).
    need_det = bool(get_features) and bool(detached)
    out, det = basic_block_fused(x, params, compute_dtype=compute_dtype, with_det=need_det)
    if get_features:
        if detached:
            # TODO(synk): forward value only; detached-branch gradient semantics are not
            # reproduced (no custom VJP on the Pallas kernel).  Forward values equal
            # conv2(conv1(x)) + x exactly, so the main path's pre-activation is reused.
            features.append(jax.lax.stop_gradient(det))
        else:
            features.append(out)
    return [out, features, get_features, detached]


def init_basic_block_params(key, in_ch, out_ch):
    k1, k2, k3, k4, k5, k6 = jax.random.split(key, 6)
    w1 = jax.random.normal(k1, (3, 3, in_ch, out_ch), jnp.float32) * 0.1
    w2 = jax.random.normal(k2, (3, 3, out_ch, out_ch), jnp.float32) * 0.1
    # BatchNorm2d inference folded into per-channel affine scale/bias (non-trivial values
    # so the folding path is actually exercised).
    s1 = jax.random.uniform(k3, (out_ch,), jnp.float32, 0.5, 1.5)
    s2 = jax.random.uniform(k4, (out_ch,), jnp.float32, 0.5, 1.5)
    b1 = jax.random.normal(k5, (out_ch,), jnp.float32) * 0.1
    b2 = jax.random.normal(k6, (out_ch,), jnp.float32) * 0.1
    return {"w1": w1, "bn1_scale": s1, "bn1_bias": b1,
            "w2": w2, "bn2_scale": s2, "bn2_bias": b2}


def _ref_forward(x_nchw, params):
    """Pure-JAX f32 reference of the same forward (NHWC conv, then back to NCHW)."""
    x = jnp.transpose(x_nchw, (0, 2, 3, 1))

    def conv_bn(v, w, s, b):
        y = jax.lax.conv_general_dilated(
            v, w, window_strides=(1, 1), padding="SAME",
            dimension_numbers=("NHWC", "HWIO", "NHWC"))
        return y * s + b

    h = jnp.maximum(conv_bn(x, params["w1"], params["bn1_scale"], params["bn1_bias"]), 0.0)
    z = conv_bn(h, params["w2"], params["bn2_scale"], params["bn2_bias"])
    out = jnp.maximum(z, 0.0) + x
    det = z + x
    tr = lambda a: jnp.transpose(a, (0, 3, 1, 2))
    return tr(out), tr(det)


if __name__ == "__main__":
    key = jax.random.PRNGKey(0)
    kx, kp = jax.random.split(key)
    # inChannels == outChannels so the identity shortcut (downsample=None) is valid.
    N, C, H, W = 2, 8, 16, 16
    x = jax.random.normal(kx, (N, C, H, W), jnp.float32)
    params = init_basic_block_params(kp, C, C)

    out_ref, det_ref = _ref_forward(x, params)

    # 1) exact-math f32 path: validates the roll/mask conv logic bit-for-bit-ish.
    out32, det32 = basic_block_fused(x, params, compute_dtype=jnp.float32, with_det=True)
    out32, det32 = jax.block_until_ready((out32, det32))
    assert out32.shape == (N, C, H, W) and det32.shape == (N, C, H, W)
    e_o = float(jnp.max(jnp.abs(out32 - out_ref)))
    e_d = float(jnp.max(jnp.abs(det32 - det_ref)))
    assert e_o < 1e-4 and e_d < 1e-4, f"f32 path mismatch: out={e_o} det={e_d}"

    # 2) performance path (default): bf16 HBM I/O + MXU operands, f32 accumulate/epilogue.
    out_bf, feats, _, _ = basic_block_forward(params, [x, [], True, True])
    out_bf = jax.block_until_ready(out_bf)
    assert out_bf.shape == (N, C, H, W)
    assert len(feats) == 1 and feats[0].shape == (N, C, H, W)
    e_o = float(jnp.max(jnp.abs(out_bf.astype(jnp.float32) - out_ref)))
    e_d = float(jnp.max(jnp.abs(feats[0].astype(jnp.float32) - det_ref)))
    assert e_o < 0.2 and e_d < 0.2, f"bf16 path mismatch: out={e_o} det={e_d}"

    print("KERNEL_OK")
</pallas_src>

<mosaic_0001>
module attributes {stable_mosaic.version = 11 : i64} {
  func.func @_basic_block_kernel(%arg0: i32, %arg1: memref<1x8x256xf32, #tpu.memory_space<vmem>>, %arg2: memref<9x8x8xf32, #tpu.memory_space<vmem>>, %arg3: memref<8x1xf32, #tpu.memory_space<vmem>>, %arg4: memref<9x8x8xf32, #tpu.memory_space<vmem>>, %arg5: memref<8x1xf32, #tpu.memory_space<vmem>>, %arg6: memref<1x8x256xf32, #tpu.memory_space<vmem>>, %arg7: memref<1x8x256xf32, #tpu.memory_space<vmem>>) attributes {dimension_semantics = [#tpu.dimension_semantics<parallel>], iteration_bounds = array<i64: 2>, scalar_prefetch = 0 : i64, scratch_operands = 0 : i64, tpu.core_type = #tpu.core_type<tc>, window_params = [{transform_indices = @transform_0, window_bounds = array<i64: 1, 8, 256>}, {pipeline_mode = #tpu.pipeline_mode<synchronous>, transform_indices = @transform_1, window_bounds = array<i64: 9, 8, 8>}, {pipeline_mode = #tpu.pipeline_mode<synchronous>, transform_indices = @transform_2, window_bounds = array<i64: 8, 1>}, {pipeline_mode = #tpu.pipeline_mode<synchronous>, transform_indices = @transform_3, window_bounds = array<i64: 9, 8, 8>}, {pipeline_mode = #tpu.pipeline_mode<synchronous>, transform_indices = @transform_4, window_bounds = array<i64: 8, 1>}, {transform_indices = @transform_5, window_bounds = array<i64: 1, 8, 256>}, {transform_indices = @transform_6, window_bounds = array<i64: 1, 8, 256>}]} {
    %0 = tpu.iota {dimensions = array<i32: 1>} : vector<1x256xi32>
    %c16_i32 = arith.constant 16 : i32
    %c0_i32 = arith.constant 0 : i32
    %1 = arith.cmpi eq, %c16_i32, %c0_i32 : i32
    %c1_i32 = arith.constant 1 : i32
    %2 = arith.select %1, %c1_i32, %c16_i32 : i32
    %3 = vector.broadcast %2 : i32 to vector<1x256xi32>
    %4 = arith.remsi %0, %3 : vector<1x256xi32>
    %c0_i32_0 = arith.constant 0 : i32
    %5 = vector.broadcast %c0_i32_0 : i32 to vector<1x256xi32>
    %6 = arith.cmpi ne, %4, %5 : vector<1x256xi32>
    %c0_i32_1 = arith.constant 0 : i32
    %7 = vector.broadcast %c0_i32_1 : i32 to vector<1x256xi32>
    %8 = arith.cmpi slt, %4, %7 : vector<1x256xi32>
    %c0_i32_2 = arith.constant 0 : i32
    %9 = arith.cmpi slt, %2, %c0_i32_2 : i32
    %10 = vector.broadcast %9 : i1 to vector<1x256xi1>
    %11 = vector.broadcast %10 : vector<1x256xi1> to vector<1x256xi1>
    %12 = arith.xori %8, %11 : vector<1x256xi1>
    %13 = arith.andi %12, %6 : vector<1x256xi1>
    %14 = vector.broadcast %2 : i32 to vector<1x256xi32>
    %15 = arith.addi %4, %14 : vector<1x256xi32>
    %16 = arith.select %13, %15, %4 : vector<1x256xi1>, vector<1x256xi32>
    %c16_i32_3 = arith.constant 16 : i32
    %17 = vector.broadcast %c16_i32_3 : i32 to vector<1x256xi32>
    %18 = arith.cmpi sge, %0, %17 : vector<1x256xi32>
    %c240_i32 = arith.constant 240 : i32
    %19 = vector.broadcast %c240_i32 : i32 to vector<1x256xi32>
    %20 = arith.cmpi slt, %0, %19 : vector<1x256xi32>
    %c1_i32_4 = arith.constant 1 : i32
    %21 = vector.broadcast %c1_i32_4 : i32 to vector<1x256xi32>
    %22 = arith.cmpi sge, %16, %21 : vector<1x256xi32>
    %c14_i32 = arith.constant 14 : i32
    %23 = vector.broadcast %c14_i32 : i32 to vector<1x256xi32>
    %24 = arith.cmpi sle, %16, %23 : vector<1x256xi32>
    %25 = arith.andi %18, %22 : vector<1x256xi1>
    %26 = arith.andi %18, %24 : vector<1x256xi1>
    %27 = arith.andi %20, %22 : vector<1x256xi1>
    %28 = arith.andi %20, %24 : vector<1x256xi1>
    %c0 = arith.constant 0 : index
    %c0_5 = arith.constant 0 : index
    %c0_6 = arith.constant 0 : index
    %29 = vector.load %arg2[%c0, %c0_5, %c0_6] : memref<9x8x8xf32, #tpu.memory_space<vmem>>, vector<9x8x8xf32>
    %c0_7 = arith.constant 0 : index
    %c0_8 = arith.constant 0 : index
    %c0_9 = arith.constant 0 : index
    %30 = vector.load %arg4[%c0_7, %c0_8, %c0_9] : memref<9x8x8xf32, #tpu.memory_space<vmem>>, vector<9x8x8xf32>
    %c0_10 = arith.constant 0 : index
    %c0_11 = arith.constant 0 : index
    %31 = vector.load %arg3[%c0_10, %c0_11] : memref<8x1xf32, #tpu.memory_space<vmem>>, vector<8x1xf32>
    %c0_12 = arith.constant 0 : index
    %c0_13 = arith.constant 0 : index
    %32 = vector.load %arg5[%c0_12, %c0_13] : memref<8x1xf32, #tpu.memory_space<vmem>>, vector<8x1xf32>
    %c0_14 = arith.constant 0 : index
    %c0_15 = arith.constant 0 : index
    %c0_16 = arith.constant 0 : index
    %33 = vector.load %arg1[%c0_14, %c0_15, %c0_16] : memref<1x8x256xf32, #tpu.memory_space<vmem>>, vector<1x8x256xf32>
    %34 = vector.shape_cast %33 : vector<1x8x256xf32> to vector<8x256xf32>
    %c17_i32 = arith.constant 17 : i32
    %35 = tpu.dynamic_rotate %34 by %c17_i32 dim 1 : vector<8x256xf32>, i32 -> vector<8x256xf32>
    %cst = arith.constant 0.000000e+00 : f32
    %36 = vector.shape_cast %25 : vector<1x256xi1> to vector<1x256xi1>
    %37 = vector.broadcast %36 : vector<1x256xi1> to vector<8x256xi1>
    %38 = vector.broadcast %cst : f32 to vector<8x256xf32>
    %39 = arith.select %37, %35, %38 : vector<8x256xi1>, vector<8x256xf32>
    %40 = vector.extract_strided_slice %29 {offsets = [0, 0, 0], sizes = [1, 8, 8], strides = [1, 1, 1]} : vector<9x8x8xf32> to vector<1x8x8xf32>
    %41 = vector.shape_cast %40 : vector<1x8x8xf32> to vector<8x8xf32>
    %cst_17 = arith.constant dense<0.000000e+00> : vector<8x256xf32>
    %42 = tpu.matmul %41, %39, %cst_17 {dimension_numbers = #tpu.dot_dimension_numbers<[1], [0], [0], [1], [0, 0, 1, 1], [], []>} : vector<8x8xf32>, vector<8x256xf32>, vector<8x256xf32> -> vector<8x256xf32>
    %c16_i32_18 = arith.constant 16 : i32
    %43 = tpu.dynamic_rotate %34 by %c16_i32_18 dim 1 : vector<8x256xf32>, i32 -> vector<8x256xf32>
    %cst_19 = arith.constant 0.000000e+00 : f32
    %44 = vector.shape_cast %18 : vector<1x256xi1> to vector<1x256xi1>
    %45 = vector.broadcast %44 : vector<1x256xi1> to vector<8x256xi1>
    %46 = vector.broadcast %cst_19 : f32 to vector<8x256xf32>
    %47 = arith.select %45, %43, %46 : vector<8x256xi1>, vector<8x256xf32>
    %48 = vector.extract_strided_slice %29 {offsets = [1, 0, 0], sizes = [1, 8, 8], strides = [1, 1, 1]} : vector<9x8x8xf32> to vector<1x8x8xf32>
    %49 = vector.shape_cast %48 : vector<1x8x8xf32> to vector<8x8xf32>
    %cst_20 = arith.constant dense<0.000000e+00> : vector<8x256xf32>
    %50 = tpu.matmul %49, %47, %cst_20 {dimension_numbers = #tpu.dot_dimension_numbers<[1], [0], [0], [1], [0, 0, 1, 1], [], []>} : vector<8x8xf32>, vector<8x256xf32>, vector<8x256xf32> -> vector<8x256xf32>
    %51 = arith.addf %42, %50 : vector<8x256xf32>
    %c15_i32 = arith.constant 15 : i32
    %52 = tpu.dynamic_rotate %34 by %c15_i32 dim 1 : vector<8x256xf32>, i32 -> vector<8x256xf32>
    %cst_21 = arith.constant 0.000000e+00 : f32
    %53 = vector.shape_cast %26 : vector<1x256xi1> to vector<1x256xi1>
    %54 = vector.broadcast %53 : vector<1x256xi1> to vector<8x256xi1>
    %55 = vector.broadcast %cst_21 : f32 to vector<8x256xf32>
    %56 = arith.select %54, %52, %55 : vector<8x256xi1>, vector<8x256xf32>
    %57 = vector.extract_strided_slice %29 {offsets = [2, 0, 0], sizes = [1, 8, 8], strides = [1, 1, 1]} : vector<9x8x8xf32> to vector<1x8x8xf32>
    %58 = vector.shape_cast %57 : vector<1x8x8xf32> to vector<8x8xf32>
    %cst_22 = arith.constant dense<0.000000e+00> : vector<8x256xf32>
    %59 = tpu.matmul %58, %56, %cst_22 {dimension_numbers = #tpu.dot_dimension_numbers<[1], [0], [0], [1], [0, 0, 1, 1], [], []>} : vector<8x8xf32>, vector<8x256xf32>, vector<8x256xf32> -> vector<8x256xf32>
    %60 = arith.addf %51, %59 : vector<8x256xf32>
    %c1_i32_23 = arith.constant 1 : i32
    %61 = tpu.dynamic_rotate %34 by %c1_i32_23 dim 1 : vector<8x256xf32>, i32 -> vector<8x256xf32>
    %cst_24 = arith.constant 0.000000e+00 : f32
    %62 = vector.shape_cast %22 : vector<1x256xi1> to vector<1x256xi1>
    %63 = vector.broadcast %62 : vector<1x256xi1> to vector<8x256xi1>
    %64 = vector.broadcast %cst_24 : f32 to vector<8x256xf32>
    %65 = arith.select %63, %61, %64 : vector<8x256xi1>, vector<8x256xf32>
    %66 = vector.extract_strided_slice %29 {offsets = [3, 0, 0], sizes = [1, 8, 8], strides = [1, 1, 1]} : vector<9x8x8xf32> to vector<1x8x8xf32>
    %67 = vector.shape_cast %66 : vector<1x8x8xf32> to vector<8x8xf32>
    %cst_25 = arith.constant dense<0.000000e+00> : vector<8x256xf32>
    %68 = tpu.matmul %67, %65, %cst_25 {dimension_numbers = #tpu.dot_dimension_numbers<[1], [0], [0], [1], [0, 0, 1, 1], [], []>} : vector<8x8xf32>, vector<8x256xf32>, vector<8x256xf32> -> vector<8x256xf32>
    %69 = arith.addf %60, %68 : vector<8x256xf32>
    %70 = vector.extract_strided_slice %29 {offsets = [4, 0, 0], sizes = [1, 8, 8], strides = [1, 1, 1]} : vector<9x8x8xf32> to vector<1x8x8xf32>
    %71 = vector.shape_cast %70 : vector<1x8x8xf32> to vector<8x8xf32>
    %cst_26 = arith.constant dense<0.000000e+00> : vector<8x256xf32>
    %72 = tpu.matmul %71, %34, %cst_26 {dimension_numbers = #tpu.dot_dimension_numbers<[1], [0], [0], [1], [0, 0, 1, 1], [], []>} : vector<8x8xf32>, vector<8x256xf32>, vector<8x256xf32> -> vector<8x256xf32>
    %73 = arith.addf %69, %72 : vector<8x256xf32>
    %c255_i32 = arith.constant 255 : i32
    %74 = tpu.dynamic_rotate %34 by %c255_i32 dim 1 : vector<8x256xf32>, i32 -> vector<8x256xf32>
    %cst_27 = arith.constant 0.000000e+00 : f32
    %75 = vector.shape_cast %24 : vector<1x256xi1> to vector<1x256xi1>
    %76 = vector.broadcast %75 : vector<1x256xi1> to vector<8x256xi1>
    %77 = vector.broadcast %cst_27 : f32 to vector<8x256xf32>
    %78 = arith.select %76, %74, %77 : vector<8x256xi1>, vector<8x256xf32>
    %79 = vector.extract_strided_slice %29 {offsets = [5, 0, 0], sizes = [1, 8, 8], strides = [1, 1, 1]} : vector<9x8x8xf32> to vector<1x8x8xf32>
    %80 = vector.shape_cast %79 : vector<1x8x8xf32> to vector<8x8xf32>
    %cst_28 = arith.constant dense<0.000000e+00> : vector<8x256xf32>
    %81 = tpu.matmul %80, %78, %cst_28 {dimension_numbers = #tpu.dot_dimension_numbers<[1], [0], [0], [1], [0, 0, 1, 1], [], []>} : vector<8x8xf32>, vector<8x256xf32>, vector<8x256xf32> -> vector<8x256xf32>
    %82 = arith.addf %73, %81 : vector<8x256xf32>
    %c241_i32 = arith.constant 241 : i32
    %83 = tpu.dynamic_rotate %34 by %c241_i32 dim 1 : vector<8x256xf32>, i32 -> vector<8x256xf32>
    %cst_29 = arith.constant 0.000000e+00 : f32
    %84 = vector.shape_cast %27 : vector<1x256xi1> to vector<1x256xi1>
    %85 = vector.broadcast %84 : vector<1x256xi1> to vector<8x256xi1>
    %86 = vector.broadcast %cst_29 : f32 to vector<8x256xf32>
    %87 = arith.select %85, %83, %86 : vector<8x256xi1>, vector<8x256xf32>
    %88 = vector.extract_strided_slice %29 {offsets = [6, 0, 0], sizes = [1, 8, 8], strides = [1, 1, 1]} : vector<9x8x8xf32> to vector<1x8x8xf32>
    %89 = vector.shape_cast %88 : vector<1x8x8xf32> to vector<8x8xf32>
    %cst_30 = arith.constant dense<0.000000e+00> : vector<8x256xf32>
    %90 = tpu.matmul %89, %87, %cst_30 {dimension_numbers = #tpu.dot_dimension_numbers<[1], [0], [0], [1], [0, 0, 1, 1], [], []>} : vector<8x8xf32>, vector<8x256xf32>, vector<8x256xf32> -> vector<8x256xf32>
    %91 = arith.addf %82, %90 : vector<8x256xf32>
    %c240_i32_31 = arith.constant 240 : i32
    %92 = tpu.dynamic_rotate %34 by %c240_i32_31 dim 1 : vector<8x256xf32>, i32 -> vector<8x256xf32>
    %cst_32 = arith.constant 0.000000e+00 : f32
    %93 = vector.shape_cast %20 : vector<1x256xi1> to vector<1x256xi1>
    %94 = vector.broadcast %93 : vector<1x256xi1> to vector<8x256xi1>
    %95 = vector.broadcast %cst_32 : f32 to vector<8x256xf32>
    %96 = arith.select %94, %92, %95 : vector<8x256xi1>, vector<8x256xf32>
    %97 = vector.extract_strided_slice %29 {offsets = [7, 0, 0], sizes = [1, 8, 8], strides = [1, 1, 1]} : vector<9x8x8xf32> to vector<1x8x8xf32>
    %98 = vector.shape_cast %97 : vector<1x8x8xf32> to vector<8x8xf32>
    %cst_33 = arith.constant dense<0.000000e+00> : vector<8x256xf32>
    %99 = tpu.matmul %98, %96, %cst_33 {dimension_numbers = #tpu.dot_dimension_numbers<[1], [0], [0], [1], [0, 0, 1, 1], [], []>} : vector<8x8xf32>, vector<8x256xf32>, vector<8x256xf32> -> vector<8x256xf32>
    %100 = arith.addf %91, %99 : vector<8x256xf32>
    %c239_i32 = arith.constant 239 : i32
    %101 = tpu.dynamic_rotate %34 by %c239_i32 dim 1 : vector<8x256xf32>, i32 -> vector<8x256xf32>
    %cst_34 = arith.constant 0.000000e+00 : f32
    %102 = vector.shape_cast %28 : vector<1x256xi1> to vector<1x256xi1>
    %103 = vector.broadcast %102 : vector<1x256xi1> to vector<8x256xi1>
    %104 = vector.broadcast %cst_34 : f32 to vector<8x256xf32>
    %105 = arith.select %103, %101, %104 : vector<8x256xi1>, vector<8x256xf32>
    %106 = vector.extract_strided_slice %29 {offsets = [8, 0, 0], sizes = [1, 8, 8], strides = [1, 1, 1]} : vector<9x8x8xf32> to vector<1x8x8xf32>
    %107 = vector.shape_cast %106 : vector<1x8x8xf32> to vector<8x8xf32>
    %cst_35 = arith.constant dense<0.000000e+00> : vector<8x256xf32>
    %108 = tpu.matmul %107, %105, %cst_35 {dimension_numbers = #tpu.dot_dimension_numbers<[1], [0], [0], [1], [0, 0, 1, 1], [], []>} : vector<8x8xf32>, vector<8x256xf32>, vector<8x256xf32> -> vector<8x256xf32>
    %109 = arith.addf %100, %108 : vector<8x256xf32>
    %110 = vector.broadcast %31 : vector<8x1xf32> to vector<8x256xf32>
    %111 = arith.addf %109, %110 : vector<8x256xf32>
    %cst_36 = arith.constant 0.000000e+00 : f32
    %112 = vector.broadcast %cst_36 : f32 to vector<8x256xf32>
    %113 = arith.maximumf %111, %112 : vector<8x256xf32>
    %c17_i32_37 = arith.constant 17 : i32
    %114 = tpu.dynamic_rotate %113 by %c17_i32_37 dim 1 : vector<8x256xf32>, i32 -> vector<8x256xf32>
    %cst_38 = arith.constant 0.000000e+00 : f32
    %115 = vector.shape_cast %25 : vector<1x256xi1> to vector<1x256xi1>
    %116 = vector.broadcast %115 : vector<1x256xi1> to vector<8x256xi1>
    %117 = vector.broadcast %cst_38 : f32 to vector<8x256xf32>
    %118 = arith.select %116, %114, %117 : vector<8x256xi1>, vector<8x256xf32>
    %119 = vector.extract_strided_slice %30 {offsets = [0, 0, 0], sizes = [1, 8, 8], strides = [1, 1, 1]} : vector<9x8x8xf32> to vector<1x8x8xf32>
    %120 = vector.shape_cast %119 : vector<1x8x8xf32> to vector<8x8xf32>
    %cst_39 = arith.constant dense<0.000000e+00> : vector<8x256xf32>
    %121 = tpu.matmul %120, %118, %cst_39 {dimension_numbers = #tpu.dot_dimension_numbers<[1], [0], [0], [1], [0, 0, 1, 1], [], []>} : vector<8x8xf32>, vector<8x256xf32>, vector<8x256xf32> -> vector<8x256xf32>
    %c16_i32_40 = arith.constant 16 : i32
    %122 = tpu.dynamic_rotate %113 by %c16_i32_40 dim 1 : vector<8x256xf32>, i32 -> vector<8x256xf32>
    %cst_41 = arith.constant 0.000000e+00 : f32
    %123 = vector.shape_cast %18 : vector<1x256xi1> to vector<1x256xi1>
    %124 = vector.broadcast %123 : vector<1x256xi1> to vector<8x256xi1>
    %125 = vector.broadcast %cst_41 : f32 to vector<8x256xf32>
    %126 = arith.select %124, %122, %125 : vector<8x256xi1>, vector<8x256xf32>
    %127 = vector.extract_strided_slice %30 {offsets = [1, 0, 0], sizes = [1, 8, 8], strides = [1, 1, 1]} : vector<9x8x8xf32> to vector<1x8x8xf32>
    %128 = vector.shape_cast %127 : vector<1x8x8xf32> to vector<8x8xf32>
    %cst_42 = arith.constant dense<0.000000e+00> : vector<8x256xf32>
    %129 = tpu.matmul %128, %126, %cst_42 {dimension_numbers = #tpu.dot_dimension_numbers<[1], [0], [0], [1], [0, 0, 1, 1], [], []>} : vector<8x8xf32>, vector<8x256xf32>, vector<8x256xf32> -> vector<8x256xf32>
    %130 = arith.addf %121, %129 : vector<8x256xf32>
    %c15_i32_43 = arith.constant 15 : i32
    %131 = tpu.dynamic_rotate %113 by %c15_i32_43 dim 1 : vector<8x256xf32>, i32 -> vector<8x256xf32>
    %cst_44 = arith.constant 0.000000e+00 : f32
    %132 = vector.shape_cast %26 : vector<1x256xi1> to vector<1x256xi1>
    %133 = vector.broadcast %132 : vector<1x256xi1> to vector<8x256xi1>
    %134 = vector.broadcast %cst_44 : f32 to vector<8x256xf32>
    %135 = arith.select %133, %131, %134 : vector<8x256xi1>, vector<8x256xf32>
    %136 = vector.extract_strided_slice %30 {offsets = [2, 0, 0], sizes = [1, 8, 8], strides = [1, 1, 1]} : vector<9x8x8xf32> to vector<1x8x8xf32>
    %137 = vector.shape_cast %136 : vector<1x8x8xf32> to vector<8x8xf32>
    %cst_45 = arith.constant dense<0.000000e+00> : vector<8x256xf32>
    %138 = tpu.matmul %137, %135, %cst_45 {dimension_numbers = #tpu.dot_dimension_numbers<[1], [0], [0], [1], [0, 0, 1, 1], [], []>} : vector<8x8xf32>, vector<8x256xf32>, vector<8x256xf32> -> vector<8x256xf32>
    %139 = arith.addf %130, %138 : vector<8x256xf32>
    %c1_i32_46 = arith.constant 1 : i32
    %140 = tpu.dynamic_rotate %113 by %c1_i32_46 dim 1 : vector<8x256xf32>, i32 -> vector<8x256xf32>
    %cst_47 = arith.constant 0.000000e+00 : f32
    %141 = vector.shape_cast %22 : vector<1x256xi1> to vector<1x256xi1>
    %142 = vector.broadcast %141 : vector<1x256xi1> to vector<8x256xi1>
    %143 = vector.broadcast %cst_47 : f32 to vector<8x256xf32>
    %144 = arith.select %142, %140, %143 : vector<8x256xi1>, vector<8x256xf32>
    %145 = vector.extract_strided_slice %30 {offsets = [3, 0, 0], sizes = [1, 8, 8], strides = [1, 1, 1]} : vector<9x8x8xf32> to vector<1x8x8xf32>
    %146 = vector.shape_cast %145 : vector<1x8x8xf32> to vector<8x8xf32>
    %cst_48 = arith.constant dense<0.000000e+00> : vector<8x256xf32>
    %147 = tpu.matmul %146, %144, %cst_48 {dimension_numbers = #tpu.dot_dimension_numbers<[1], [0], [0], [1], [0, 0, 1, 1], [], []>} : vector<8x8xf32>, vector<8x256xf32>, vector<8x256xf32> -> vector<8x256xf32>
    %148 = arith.addf %139, %147 : vector<8x256xf32>
    %149 = vector.extract_strided_slice %30 {offsets = [4, 0, 0], sizes = [1, 8, 8], strides = [1, 1, 1]} : vector<9x8x8xf32> to vector<1x8x8xf32>
    %150 = vector.shape_cast %149 : vector<1x8x8xf32> to vector<8x8xf32>
    %cst_49 = arith.constant dense<0.000000e+00> : vector<8x256xf32>
    %151 = tpu.matmul %150, %113, %cst_49 {dimension_numbers = #tpu.dot_dimension_numbers<[1], [0], [0], [1], [0, 0, 1, 1], [], []>} : vector<8x8xf32>, vector<8x256xf32>, vector<8x256xf32> -> vector<8x256xf32>
    %152 = arith.addf %148, %151 : vector<8x256xf32>
    %c255_i32_50 = arith.constant 255 : i32
    %153 = tpu.dynamic_rotate %113 by %c255_i32_50 dim 1 : vector<8x256xf32>, i32 -> vector<8x256xf32>
    %cst_51 = arith.constant 0.000000e+00 : f32
    %154 = vector.shape_cast %24 : vector<1x256xi1> to vector<1x256xi1>
    %155 = vector.broadcast %154 : vector<1x256xi1> to vector<8x256xi1>
    %156 = vector.broadcast %cst_51 : f32 to vector<8x256xf32>
    %157 = arith.select %155, %153, %156 : vector<8x256xi1>, vector<8x256xf32>
    %158 = vector.extract_strided_slice %30 {offsets = [5, 0, 0], sizes = [1, 8, 8], strides = [1, 1, 1]} : vector<9x8x8xf32> to vector<1x8x8xf32>
    %159 = vector.shape_cast %158 : vector<1x8x8xf32> to vector<8x8xf32>
    %cst_52 = arith.constant dense<0.000000e+00> : vector<8x256xf32>
    %160 = tpu.matmul %159, %157, %cst_52 {dimension_numbers = #tpu.dot_dimension_numbers<[1], [0], [0], [1], [0, 0, 1, 1], [], []>} : vector<8x8xf32>, vector<8x256xf32>, vector<8x256xf32> -> vector<8x256xf32>
    %161 = arith.addf %152, %160 : vector<8x256xf32>
    %c241_i32_53 = arith.constant 241 : i32
    %162 = tpu.dynamic_rotate %113 by %c241_i32_53 dim 1 : vector<8x256xf32>, i32 -> vector<8x256xf32>
    %cst_54 = arith.constant 0.000000e+00 : f32
    %163 = vector.shape_cast %27 : vector<1x256xi1> to vector<1x256xi1>
    %164 = vector.broadcast %163 : vector<1x256xi1> to vector<8x256xi1>
    %165 = vector.broadcast %cst_54 : f32 to vector<8x256xf32>
    %166 = arith.select %164, %162, %165 : vector<8x256xi1>, vector<8x256xf32>
    %167 = vector.extract_strided_slice %30 {offsets = [6, 0, 0], sizes = [1, 8, 8], strides = [1, 1, 1]} : vector<9x8x8xf32> to vector<1x8x8xf32>
    %168 = vector.shape_cast %167 : vector<1x8x8xf32> to vector<8x8xf32>
    %cst_55 = arith.constant dense<0.000000e+00> : vector<8x256xf32>
    %169 = tpu.matmul %168, %166, %cst_55 {dimension_numbers = #tpu.dot_dimension_numbers<[1], [0], [0], [1], [0, 0, 1, 1], [], []>} : vector<8x8xf32>, vector<8x256xf32>, vector<8x256xf32> -> vector<8x256xf32>
    %170 = arith.addf %161, %169 : vector<8x256xf32>
    %c240_i32_56 = arith.constant 240 : i32
    %171 = tpu.dynamic_rotate %113 by %c240_i32_56 dim 1 : vector<8x256xf32>, i32 -> vector<8x256xf32>
    %cst_57 = arith.constant 0.000000e+00 : f32
    %172 = vector.shape_cast %20 : vector<1x256xi1> to vector<1x256xi1>
    %173 = vector.broadcast %172 : vector<1x256xi1> to vector<8x256xi1>
    %174 = vector.broadcast %cst_57 : f32 to vector<8x256xf32>
    %175 = arith.select %173, %171, %174 : vector<8x256xi1>, vector<8x256xf32>
    %176 = vector.extract_strided_slice %30 {offsets = [7, 0, 0], sizes = [1, 8, 8], strides = [1, 1, 1]} : vector<9x8x8xf32> to vector<1x8x8xf32>
    %177 = vector.shape_cast %176 : vector<1x8x8xf32> to vector<8x8xf32>
    %cst_58 = arith.constant dense<0.000000e+00> : vector<8x256xf32>
    %178 = tpu.matmul %177, %175, %cst_58 {dimension_numbers = #tpu.dot_dimension_numbers<[1], [0], [0], [1], [0, 0, 1, 1], [], []>} : vector<8x8xf32>, vector<8x256xf32>, vector<8x256xf32> -> vector<8x256xf32>
    %179 = arith.addf %170, %178 : vector<8x256xf32>
    %c239_i32_59 = arith.constant 239 : i32
    %180 = tpu.dynamic_rotate %113 by %c239_i32_59 dim 1 : vector<8x256xf32>, i32 -> vector<8x256xf32>
    %cst_60 = arith.constant 0.000000e+00 : f32
    %181 = vector.shape_cast %28 : vector<1x256xi1> to vector<1x256xi1>
    %182 = vector.broadcast %181 : vector<1x256xi1> to vector<8x256xi1>
    %183 = vector.broadcast %cst_60 : f32 to vector<8x256xf32>
    %184 = arith.select %182, %180, %183 : vector<8x256xi1>, vector<8x256xf32>
    %185 = vector.extract_strided_slice %30 {offsets = [8, 0, 0], sizes = [1, 8, 8], strides = [1, 1, 1]} : vector<9x8x8xf32> to vector<1x8x8xf32>
    %186 = vector.shape_cast %185 : vector<1x8x8xf32> to vector<8x8xf32>
    %cst_61 = arith.constant dense<0.000000e+00> : vector<8x256xf32>
    %187 = tpu.matmul %186, %184, %cst_61 {dimension_numbers = #tpu.dot_dimension_numbers<[1], [0], [0], [1], [0, 0, 1, 1], [], []>} : vector<8x8xf32>, vector<8x256xf32>, vector<8x256xf32> -> vector<8x256xf32>
    %188 = arith.addf %179, %187 : vector<8x256xf32>
    %189 = vector.broadcast %32 : vector<8x1xf32> to vector<8x256xf32>
    %190 = arith.addf %188, %189 : vector<8x256xf32>
    %cst_62 = arith.constant 0.000000e+00 : f32
    %191 = vector.broadcast %cst_62 : f32 to vector<8x256xf32>
    %192 = arith.maximumf %190, %191 : vector<8x256xf32>
    %193 = arith.addf %192, %34 : vector<8x256xf32>
    %c0_63 = arith.constant 0 : index
    %c0_64 = arith.constant 0 : index
    %c0_65 = arith.constant 0 : index
    %194 = vector.load %arg6[%c0_63, %c0_64, %c0_65] : memref<1x8x256xf32, #tpu.memory_space<vmem>>, vector<1x8x256xf32>
    %195 = vector.shape_cast %194 : vector<1x8x256xf32> to vector<8x256xf32>
    %196 = vector.shape_cast %193 : vector<8x256xf32> to vector<1x8x256xf32>
    tpu.vector_store %arg6[%c0_63, %c0_64, %c0_65], %196 {strides = array<i32>} : memref<1x8x256xf32, #tpu.memory_space<vmem>>, vector<1x8x256xf32>,
    %197 = arith.addf %190, %34 : vector<8x256xf32>
    %c0_66 = arith.constant 0 : index
    %c0_67 = arith.constant 0 : index
    %c0_68 = arith.constant 0 : index
    %198 = vector.load %arg7[%c0_66, %c0_67, %c0_68] : memref<1x8x256xf32, #tpu.memory_space<vmem>>, vector<1x8x256xf32>
    %199 = vector.shape_cast %198 : vector<1x8x256xf32> to vector<8x256xf32>
    %200 = vector.shape_cast %197 : vector<8x256xf32> to vector<1x8x256xf32>
    tpu.vector_store %arg7[%c0_66, %c0_67, %c0_68], %200 {strides = array<i32>} : memref<1x8x256xf32, #tpu.memory_space<vmem>>, vector<1x8x256xf32>,
    return
  }
  func.func @transform_0(%arg0: i32) -> (i32, i32, i32) {
    %c0_i32 = arith.constant 0 : i32
    %c0_i32_0 = arith.constant 0 : i32
    %c0_i32_1 = arith.constant 0 : i32
    return %arg0, %c0_i32, %c0_i32_0 : i32, i32, i32
  }
  func.func @transform_1(%arg0: i32) -> (i32, i32, i32) {
    %c0_i32 = arith.constant 0 : i32
    %c0_i32_0 = arith.constant 0 : i32
    %c0_i32_1 = arith.constant 0 : i32
    %c0_i32_2 = arith.constant 0 : i32
    return %c0_i32, %c0_i32_0, %c0_i32_1 : i32, i32, i32
  }
  func.func @transform_2(%arg0: i32) -> (i32, i32) {
    %c0_i32 = arith.constant 0 : i32
    %c0_i32_0 = arith.constant 0 : i32
    %c0_i32_1 = arith.constant 0 : i32
    return %c0_i32, %c0_i32_0 : i32, i32
  }
  func.func @transform_3(%arg0: i32) -> (i32, i32, i32) {
    %c0_i32 = arith.constant 0 : i32
    %c0_i32_0 = arith.constant 0 : i32
    %c0_i32_1 = arith.constant 0 : i32
    %c0_i32_2 = arith.constant 0 : i32
    return %c0_i32, %c0_i32_0, %c0_i32_1 : i32, i32, i32
  }
  func.func @transform_4(%arg0: i32) -> (i32, i32) {
    %c0_i32 = arith.constant 0 : i32
    %c0_i32_0 = arith.constant 0 : i32
    %c0_i32_1 = arith.constant 0 : i32
    return %c0_i32, %c0_i32_0 : i32, i32
  }
  func.func @transform_5(%arg0: i32) -> (i32, i32, i32) {
    %c0_i32 = arith.constant 0 : i32
    %c0_i32_0 = arith.constant 0 : i32
    %c0_i32_1 = arith.constant 0 : i32
    return %arg0, %c0_i32, %c0_i32_0 : i32, i32, i32
  }
  func.func @transform_6(%arg0: i32) -> (i32, i32, i32) {
    %c0_i32 = arith.constant 0 : i32
    %c0_i32_0 = arith.constant 0 : i32
    %c0_i32_1 = arith.constant 0 : i32
    return %arg0, %c0_i32, %c0_i32_0 : i32, i32, i32
  }
}

</mosaic_0001>

<bundles_post_ra>
// kernel: tpu_custom_call.1
= control target key start
LH: loop header
LB: loop body
LE: loop exit
PB: predicated region body
PF: predicated region fallthrough
CT: control target
= control target key end

     0   :  { %12 = vsyncpa [#allocation3], 0  ;;  %s2740_s0 = inlined_call_operand.vmem [shape: f32[2,8,256], index: 0, kind: input, shape index: {}]   ;;  %s2741_s1 = inlined_call_operand.vmem [shape: f32[9,8,8], index: 1, kind: input, shape index: {}]   ;;  %s2742_s2 = inlined_call_operand.vmem [shape: f32[8,1], index: 2, kind: input, shape index: {}]   ;;  %s2743_s3 = inlined_call_operand.vmem [shape: f32[9,8,8], index: 3, kind: input, shape index: {}]   ;;  %s2744_s4 = inlined_call_operand.vmem [shape: f32[8,1], index: 4, kind: input, shape index: {}]   ;;  %s2745_s5 = inlined_call_operand.hbm [shape: f32[2,8,256], index: 5, kind: output, shape index: {0}]   ;;  %s2746_s6 = inlined_call_operand.hbm [shape: f32[2,8,256], index: 6, kind: output, shape index: {1}]  }
   0x1   :  { %14 = vsyncpa [#allocation3 + $0x1], 0 }
   0x2   :  { %15 = vsyncpa [#allocation5], 0 }
   0x3   :  { %17 = vsyncpa [#allocation5 + $0x1], 0  ;;  %s2265_s21 = smov 0   ;;  %s2267_s22 = smov 0  }
   0x4   :  { %s2269_s23 = smov 0   ;;  %s2271_s24 = smov 0  }
   0x5 LB: > { %s2286_s25 = sadd.s32 4294967295, %s2216_s24   ;;  %s2006_s26 = sadd.s32 4294967294, %s2216_s24   ;;  %s2216_s24 = sphi %s2271_s24, %s2777_s24   ;;  %s2212_s23 = sphi %s2269_s23, %s2776_s23   ;;  %s2208_s22 = sphi %s2267_s22, %s2775_s22   ;;  %s2204_s21 = sphi %s2265_s21, %s2774_s21  }
   0x6   : > { %s2290_s27 = sadd.s32 1, %s2216_s24   ;;  %s140_s28 = sadd.s32 1, %s2212_s23 }
   0x7   : > { %s137_s29 = ssub.s32 %s2216_s24, %s2290_s27  ;;  %p150_p0 = scmp.ne.s32.totalorder %s2212_s23, %s2208_s22 }
   0x8   : > { %p138_p1 = scmp.eq.s32.totalorder %s137_s29, 0  ;;  %p151_p2 = scmp.eq.s32.totalorder %s2286_s25, 1 }
   0x9   : > { %p156_p3 = scmp.ne.s32.totalorder %s2208_s22, %s2204_s21  ;;  %p157_p4 = scmp.eq.s32.totalorder %s2006_s26, 1 }
   0xa   : > { %s2301_s30 = scalar_select %p138_p1, %s2212_s23, %s140_s28  }
   0xb   : > { %p2303_p5 = por %p151_p2, %p150_p0  ;;  %p2307_p6 = por %p157_p4, %p156_p3 }
   0xc   : > { %p2009_p7 = scmp.ge.s32.totalorder %s2216_s24, 1  ;;  %p221_p8 = scmp.lt.s32.totalorder %s2216_s24, 3 }
   0xe   : > { %p222_p9 = pnand %p2009_p7, %p221_p8 }
   0xf   : > { %p256_p10 = scmp.lt.s32.totalorder (!%p222_p9), %s2286_s25, 1  ;;  %s2219_s14 = smov (!%p222_p9), 17  }
  0x10   : > { %225 = sbr.rel (%p222_p9) target bundleno = 757 (0x2f5), region = 40  ;;  %s2220_s15 = smov (!%p222_p9), 16  }
  0x11   : > { %s2221_s16 = smov (!%p222_p9), 15   ;;  %s2222_s17 = smov (!%p222_p9), 1  }
  0x12   : > { %s2223_s18 = smov (!%p222_p9), 127   ;;  %s2225_s19 = smov (!%p222_p9), 113  }
  0x13   : > { %s2226_s20 = smov (!%p222_p9), 112   ;;  %s2227_s26 = smov (!%p222_p9), 111  }
  0x15   : > { %s257_s9 = scalar_select %p256_p10, %s2286_s25, 1  ;;  %v2218_v0 = vmov 0.0   ;;  %v2224_v3 = vmov 0   ;;  %v322_v4 = vld [vmem:[%s2742_s2] sm:$0xff]  ;;  %v261_v5 = vlaneseq  ;;  %vm352_vm6 = vcmask 64512   ;;  %v305_v22 = vld [vmem:[%s2741_s1 + $0x8] sm:$0xff] }
  0x16   : > { %420 = vmatprep.mubr.f32.mxu0 %v2218_v0  ;;  %494 = vmatprep.mubr.f32.mxu1 %v2218_v0  ;;  %v304_v23 = vld [vmem:[%s2741_s1] sm:$0xff]  ;;  %v306_v30 = vld [vmem:[%s2741_s1 + $0x10] sm:$0xff]  ;;  %v307_v35 = vld [vmem:[%s2741_s1 + $0x18] sm:$0xff] }
  0x17   : > { %s2068_s10 = sshll.u32 %s257_s9, 4  ;;  %2125 = vset.pattern.permute.xlu0 %v2224_v3  ;;  %v2359_v6 = vand.u32 127, %v261_v5  ;;  %v308_v36 = vld [vmem:[%s2741_s1 + $0x20] sm:$0xff]  ;;  %v309_v41 = vld [vmem:[%s2741_s1 + $0x28] sm:$0xff]  ;;  %v310_v47 = vld [vmem:[%s2741_s1 + $0x30] sm:$0xff] }
  0x18   : > { %s260_s13 = scalar_lea.vmem %s2740_s0, %s2068_s10  ;;  %v311_v52 = vld [vmem:[%s2741_s1 + $0x38] sm:$0xff]  ;;  %v312_v58 = vld [vmem:[%s2741_s1 + $0x40] sm:$0xff]  ;;  %v318_v13 = vld [vmem:[%s2743_s3 + $0x28] sm:$0xff] }
  0x19   : > { %v2320_v1 = vld [vmem:[%s260_s13] sm:$0xff]  ;;  %v2326_v2 = vld [vmem:[%s260_s13 + $0x8] sm:$0xff]  ;;  %v2362_v7 = vadd.s32 128, %v2359_v6  ;;  %v268_v8 = vand.u32 15, %v2359_v6  ;;  %vm288_vm0 = vcmp.ge.s32.totalorder %v2359_v6, 16  ;;  %vm343_vm2 = vcmp.lt.s32.totalorder %v2359_v6, 16 }
  0x1a   : > { %326 = vrot.lane.b32.xlu1 %v2320_v1, %s2219_s14  ;;  %339 = vrot.lane.b32.xlu0 %v2320_v1, %s2220_s15  ;;  %vm330_vm3 = vcmp.lt.s32.totalorder %v2359_v6, 17  ;;  %vm505_vm8 = vcmp.lt.s32.totalorder %v2359_v6, 15  ;;  %vm2749_vm11 = vcmp.lt.s32.totalorder %v2359_v6, 1  ;;  %vm2747_vm12 = vcmp.lt.s32.totalorder %v2359_v6, 127  ;;  %v317_v27 = vld [vmem:[%s2743_s3 + $0x20] sm:$0xff] }
  0x1b   : > { %v275_v9 = vand.u32 15, %v2362_v7  ;;  %vm2367_vm1 = vcmp.ge.s32.totalorder %v268_v8, 1  ;;  %vm2385_vm7 = vcmp.le.s32.totalorder %v268_v8, 14  ;;  %vm291_vm13 = vcmp.lt.s32.totalorder %v2362_v7, 240 }
  0x1c   : > { %vm2381_vm5 = vmand %vm288_vm0, %vm2367_vm1  ;;  %vm2748_vm14 = vcmp.lt.s32.totalorder %v2359_v6, 113 }
  0x1d   : > { %vm2373_vm4 = vcmp.ge.s32.totalorder %v275_v9, 1  ;;  %vm2410_vm9 = vcmp.le.s32.totalorder %v275_v9, 14  ;;  %vm2419_vm10 = vmand %vm288_vm0, %vm2385_vm7 }
  0x1e   : > { %328 = vrot.lane.b32.xlu1 %v2326_v2, %s2219_s14  ;;  %341 = vrot.lane.b32.xlu0 %v2326_v2, %s2220_s15  ;;  %vm2478_vm15 = vmand %vm291_vm13, %vm2373_vm4 }
  0x22   : > { %503 = vrot.lane.b32.xlu1 %v2326_v2, %s2221_s16  ;;  %501 = vrot.lane.b32.xlu0 %v2320_v1, %s2221_s16 }
  0x26   : > { %592 = vrot.lane.b32.xlu1 %v2326_v2, %s2222_s17  ;;  %590 = vrot.lane.b32.xlu0 %v2320_v1, %s2222_s17 }
  0x2a   : > { %757 = vrot.lane.b32.xlu1 %v2326_v2, %s2223_s18  ;;  %755 = vrot.lane.b32.xlu0 %v2320_v1, %s2223_s18 }
  0x2e   : > { %846 = vrot.lane.b32.xlu1 %v2326_v2, %s2225_s19  ;;  %844 = vrot.lane.b32.xlu0 %v2320_v1, %s2225_s19 }
  0x32   : > { %935 = vrot.lane.b32.xlu1 %v2326_v2, %s2226_s20  ;;  %933 = vrot.lane.b32.xlu0 %v2320_v1, %s2226_s20 }
  0x36   : > { %1024 = vrot.lane.b32.xlu1 %v2326_v2, %s2227_s26  ;;  %1022 = vrot.lane.b32.xlu0 %v2320_v1, %s2227_s26 }
  0x3a   : > { %1113 = vperm.xlu0 %2125, %v322_v4  }
  0x8c   : > { %v327_v10 = vpop.permute.xlu1 %326  ;;  %v340_v11 = vpop.permute.xlu0 %339 }
  0x90   : > { %v329_v14 = vpop.permute.xlu1 %328  ;;  %v342_v15 = vpop.permute.xlu0 %341 }
  0x91   : > { %v344_v18 = vsel %vm343_vm2, %v340_v11, %v342_v15  ;;  %v331_v19 = vsel %vm330_vm3, %v327_v10, %v329_v14  ;;  %v345_v20 = vsel %vm343_vm2, %v342_v15, %v340_v11  ;;  %v332_v21 = vsel %vm330_vm3, %v329_v14, %v327_v10 }
  0x92   : > { %386 = vmatprep.subr.mxu0 %v344_v18  ;;  %2016 = vmatprep.subr.msk.mxu1 %vm2373_vm4, %v331_v19 }
  0x93   : > { %2014 = vmatpush1.msk.msra.mxu0 %vm288_vm0, %v345_v20  ;;  %2017 = vmatpush1.msk.msra.mxu1 %vm2381_vm5, %v332_v21 }
  0x94   : > { %v504_v25 = vpop.permute.xlu1 %503  ;;  %v502_v26 = vpop.permute.xlu0 %501  ;;  %2015 = vmatmul.mubr.msk.f32.vlgmr.msra.gmra.mxu0 %vm352_vm6, %v305_v22  ;;  %2018 = vmatmul.mubr.msk.f32.vlgmr.msra.gmra.mxu1 %vm352_vm6, %v304_v23 }
  0x95   : > { %v506_v28 = vsel %vm505_vm8, %v502_v26, %v504_v25  ;;  %v507_v29 = vsel %vm505_vm8, %v504_v25, %v502_v26  ;;  %581 = vmatprep.mubr.f32.mxu0 %v2218_v0  ;;  %670 = vmatprep.mubr.f32.mxu1 %v2218_v0 }
  0x96   : > { %2019 = vmatprep.subr.msk.mxu0 %vm2410_vm9, %v506_v28 }
  0x97   : > { %2020 = vmatpush1.msk.msra.mxu0 %vm2419_vm10, %v507_v29 }
  0x98   : > { %v593_v31 = vpop.permute.xlu1 %592  ;;  %v591_v32 = vpop.permute.xlu0 %590  ;;  %2021 = vmatmul.mubr.msk.f32.vlgmr.msra.gmra.mxu0 %vm352_vm6, %v306_v30  ;;  %712 = vmatprep.subr.mxu0 %v2326_v2 }
  0x99   : > { %v595_v33 = vsel %vm2749_vm11, %v591_v32, %v593_v31  ;;  %v596_v34 = vsel %vm2749_vm11, %v593_v31, %v591_v32  ;;  %713 = vmatpush1.msra.mxu0 %v2320_v1  ;;  %746 = vmatprep.mubr.f32.mxu0 %v2218_v0  ;;  %vm2512_vm11 = vmand %vm291_vm13, %vm2410_vm9 }
  0x9a   : > { %2022 = vmatprep.subr.msk.mxu1 %vm2373_vm4, %v595_v33 }
  0x9b   : > { %2023 = vmatpush1.msk.msra.mxu1 %vm2367_vm1, %v596_v34 }
  0x9c   : > { %v758_v37 = vpop.permute.xlu1 %757  ;;  %v756_v38 = vpop.permute.xlu0 %755  ;;  %2024 = vmatmul.mubr.msk.f32.vlgmr.msra.gmra.mxu1 %vm352_vm6, %v307_v35  ;;  %2025 = vmatmul.mubr.msk.f32.vlgmr.msra.gmra.mxu0 %vm352_vm6, %v308_v36 }
  0x9d   : > { %v760_v39 = vsel %vm2747_vm12, %v756_v38, %v758_v37  ;;  %v761_v40 = vsel %vm2747_vm12, %v758_v37, %v756_v38  ;;  %835 = vmatprep.mubr.f32.mxu1 %v2218_v0  ;;  %924 = vmatprep.mubr.f32.mxu0 %v2218_v0  ;;  %vm937_vm12 = vcmp.lt.s32.totalorder %v2359_v6, 112 }
  0x9e   : > { %2026 = vmatprep.subr.msk.mxu1 %vm2410_vm9, %v761_v40 }
  0x9f   : > { %2027 = vmatpush1.msk.msra.mxu1 %vm2385_vm7, %v760_v39 }
  0xa0   : > { %v847_v43 = vpop.permute.xlu1 %846  ;;  %v845_v44 = vpop.permute.xlu0 %844  ;;  %2028 = vmatmul.mubr.msk.f32.vlgmr.msra.gmra.mxu1 %vm352_vm6, %v309_v41 }
  0xa1   : > { %v849_v45 = vsel %vm2748_vm14, %v845_v44, %v847_v43  ;;  %v850_v46 = vsel %vm2748_vm14, %v847_v43, %v845_v44  ;;  %1013 = vmatprep.mubr.f32.mxu1 %v2218_v0  ;;  %vm1026_vm14 = vcmp.lt.s32.totalorder %v2359_v6, 111 }
  0xa2   : > { %2029 = vmatprep.subr.msk.mxu0 %vm2478_vm15, %v850_v46  ;;  %v323_v46 = vld [vmem:[%s2744_s4] sm:$0xff] }
  0xa3   : > { %2030 = vmatpush1.msk.msra.mxu0 %vm2367_vm1, %v849_v45 }
  0xa4   : > { %v936_v48 = vpop.permute.xlu1 %935  ;;  %2031 = vmatmul.mubr.msk.f32.vlgmr.msra.gmra.mxu0 %vm352_vm6, %v310_v47  ;;  %v934_v49 = vpop.permute.xlu0 %933 }
  0xa5   : > { %v938_v50 = vsel %vm937_vm12, %v934_v49, %v936_v48  ;;  %v939_v51 = vsel %vm937_vm12, %v936_v48, %v934_v49  ;;  %1102 = vmatprep.mubr.f32.mxu0 %v2218_v0 }
  0xa6   : > { %2032 = vmatprep.subr.msk.mxu1 %vm291_vm13, %v939_v51 }
  0xa7   : > { %980 = vmatpush1.msra.mxu1 %v938_v50 }
  0xa8   : > { %v1025_v54 = vpop.permute.xlu1 %1024  ;;  %2033 = vmatmul.mubr.msk.f32.vlgmr.msra.gmra.mxu1 %vm352_vm6, %v311_v52  ;;  %v1023_v55 = vpop.permute.xlu0 %1022 }
  0xa9   : > { %v1027_v56 = vsel %vm1026_vm14, %v1023_v55, %v1025_v54  ;;  %v1028_v57 = vsel %vm1026_vm14, %v1025_v54, %v1023_v55  ;;  %1203 = vmatprep.mubr.f32.mxu1 %v2218_v0  ;;  %v314_v54 = vld [vmem:[%s2743_s3 + $0x8] sm:$0xff] }
  0xaa   : > { %2034 = vmatprep.subr.msk.mxu0 %vm2512_vm11, %v1028_v57 }
  0xab   : > { %2035 = vmatpush1.msk.msra.mxu0 %vm2385_vm7, %v1027_v56 }
  0xac   : > { %2036 = vmatmul.mubr.msk.f32.vlgmr.msra.gmra.mxu0 %vm352_vm6, %v312_v58 }
  0xad   : > { %1277 = vmatprep.mubr.f32.mxu0 %v2218_v0 }
  0xb5   : > { %v1114_v36 = vpop.permute.xlu0 %1113 }
 0x154   : > { %v422_v59 = vpop.f32.mrf.mxu0  ;;  %v496_v60 = vpop.f32.mrf.mxu1 }
 0x155   : > { %v497_v61 = vadd.f32 %v496_v60, %v422_v59  ;;  %v313_v59 = vld [vmem:[%s2743_s3] sm:$0xff] }
 0x156   : > { %v424_v62 = vpop.f32.mrf.mxu0  ;;  %v498_v63 = vpop.f32.mrf.mxu1 }
 0x157   : > { %v499_v3 = vadd.f32 %v498_v63, %v424_v62  ;;  %v315_v63 = vld [vmem:[%s2743_s3 + $0x10] sm:$0xff] }
 0x158   : > { %v583_v4 = vpop.f32.mrf.mxu0 }
 0x159   : > { %v588_v5 = vadd.f32 %v583_v4, %v497_v61 }
 0x15a   : > { %v585_v8 = vpop.f32.mrf.mxu0 }
 0x15b   : > { %v589_v9 = vadd.f32 %v585_v8, %v499_v3  ;;  %v316_v8 = vld [vmem:[%s2743_s3 + $0x18] sm:$0xff] }
 0x15c   : > { %v672_v10 = vpop.f32.mrf.mxu1  ;;  %v748_v11 = vpop.f32.mrf.mxu0 }
 0x15d   : > { %v677_v14 = vadd.f32 %v672_v10, %v588_v5 }
 0x15e   : > { %v674_v15 = vpop.f32.mrf.mxu1  ;;  %v750_v20 = vpop.f32.mrf.mxu0 }
 0x15f   : > { %v678_v18 = vadd.f32 %v674_v15, %v589_v9  ;;  %v753_v19 = vadd.f32 %v748_v11, %v677_v14 }
 0x160   : > { %v837_v21 = vpop.f32.mrf.mxu1 }
 0x161   : > { %v754_v22 = vadd.f32 %v750_v20, %v678_v18  ;;  %v842_v23 = vadd.f32 %v837_v21, %v753_v19  ;;  %v319_v20 = vld [vmem:[%s2743_s3 + $0x30] sm:$0xff] }
 0x162   : > { %v839_v25 = vpop.f32.mrf.mxu1 }
 0x163   : > { %v843_v28 = vadd.f32 %v839_v25, %v754_v22  ;;  %v320_v25 = vld [vmem:[%s2743_s3 + $0x38] sm:$0xff] }
 0x164   : > { %v926_v26 = vpop.f32.mrf.mxu0 }
 0x165   : > { %v931_v29 = vadd.f32 %v926_v26, %v842_v23 }
 0x166   : > { %v928_v30 = vpop.f32.mrf.mxu0 }
 0x167   : > { %v932_v33 = vadd.f32 %v928_v30, %v843_v28 }
 0x168   : > { %v1015_v31 = vpop.f32.mrf.mxu1 }
 0x169   : > { %v1020_v34 = vadd.f32 %v1015_v31, %v931_v29  ;;  %v321_v29 = vld [vmem:[%s2743_s3 + $0x40] sm:$0xff] }
 0x16a   : > { %v1017_v32 = vpop.f32.mrf.mxu1 }
 0x16b   : > { %v1021_v37 = vadd.f32 %v1017_v32, %v932_v33 }
 0x16c   : > { %v1104_v35 = vpop.f32.mrf.mxu0 }
 0x16d   : > { %v1109_v38 = vadd.f32 %v1104_v35, %v1020_v34 }
 0x16e   : > { %v1106_v39 = vpop.f32.mrf.mxu0 }
 0x16f   : > { %v1110_v40 = vadd.f32 %v1106_v39, %v1021_v37  ;;  %v1116_v41 = vadd.f32 %v1114_v36, %v1109_v38 }
 0x171   : > { %v1117_v43 = vadd.f32 %v1114_v36, %v1110_v40  ;;  %v1118_v44 = vmax.f32 %v1116_v41, 0.0 }
 0x173   : > { %1120 = vrot.lane.b32.xlu0 %v1118_v44, %s2219_s14  ;;  %1128 = vrot.lane.b32.xlu1 %v1118_v44, %s2220_s15  ;;  %v1119_v45 = vmax.f32 %v1117_v43, 0.0 }
 0x177   : > { %1284 = vrot.lane.b32.xlu0 %v1118_v44, %s2221_s16  ;;  %1130 = vrot.lane.b32.xlu1 %v1119_v45, %s2220_s15 }
 0x17b   : > { %1368 = vrot.lane.b32.xlu0 %v1118_v44, %s2222_s17  ;;  %1122 = vrot.lane.b32.xlu1 %v1119_v45, %s2219_s14 }
 0x17f   : > { %1528 = vrot.lane.b32.xlu0 %v1118_v44, %s2223_s18  ;;  %1286 = vrot.lane.b32.xlu1 %v1119_v45, %s2221_s16 }
 0x183   : > { %1612 = vrot.lane.b32.xlu0 %v1118_v44, %s2225_s19  ;;  %1370 = vrot.lane.b32.xlu1 %v1119_v45, %s2222_s17  ;;  %s2228_s17 = smov [#allocation4]  }
 0x187   : > { %1696 = vrot.lane.b32.xlu0 %v1118_v44, %s2226_s20  ;;  %1530 = vrot.lane.b32.xlu1 %v1119_v45, %s2223_s18  ;;  %s2654_s18 = sand.u32 1, %s2208_s22  }
 0x188   : > { %s1887_s14 = scalar_lea.sflag [#allocation5], %s2654_s18 }
 0x18b   : > { %1780 = vrot.lane.b32.xlu0 %v1118_v44, %s2227_s26  ;;  %1614 = vrot.lane.b32.xlu1 %v1119_v45, %s2225_s19  ;;  %s2010_s19 = sshll.u32 %s2654_s18, 4 }
 0x18c   : > { %s2659_s29 = scalar_lea.vmem [#allocation2], %s2010_s19 }
 0x18d   : > { %s1901_s9 = sshll.u32 %s2659_s29, 4  ;;  %s2678_s9 = int_to_ptr.vmem [resolvable:$true] %s1901_s9 }
 0x18f   : > { %1866 = vperm.xlu0 %2125, %v323_v46   ;;  %1698 = vrot.lane.b32.xlu1 %v1119_v45, %s2226_s20  ;;  %s2069_s20 = sshll.u32 %s2286_s25, 8 }
 0x190   : > { %s2667_s11 = scalar_lea.hbm %s2746_s6, %s2069_s20  ;;  %s2676_s13 = scalar_lea.hbm %s2745_s5, %s2069_s20 }
 0x193   : > { %1782 = vrot.lane.b32.xlu1 %v1119_v45, %s2227_s26  ;;  %s255_s26 = scalar_lea.vmem [#allocation4], %s2010_s19  ;;  %s2130_s19 = sshll.u32 %s2228_s17, 4  ;;  %s2131_s19 = int_to_ptr.vmem [resolvable:$false] %s2130_s19 }
 0x194   : > { %s1915_s28 = sshll.u32 %s255_s26, 4  ;;  %s2132_s25 = scalar_lea.vmem %s2131_s19, 512  ;;  %s2669_s28 = int_to_ptr.vmem [resolvable:$true] %s1915_s28 }
 0x195   : > { %s2126_s16 = scalar_lea.vmem %s2669_s28, 256  ;;  %p2133_p0 = scmp.lt.s32.totalorder %s2669_s28, %s2131_s19 }
 0x196   : > { %p2127_p11 = scmp.ne.s32.totalorder %s2669_s28, %s2126_s16  ;;  %p2134_p1 = scmp.lt.s32.totalorder %s2132_s25, %s2126_s16 }
 0x198   : > { %p2128_p12 = pnand %p2127_p11, %p2303_p5  ;;  %p2135_p2 = por %p2134_p1, %p2133_p0 }
 0x19a   : > { %p2129_p13 = pneg %p2128_p12 }
 0x19c   : > { %p2136_p3 = pnand %p2135_p2, %p2129_p13 }
 0x1e5   : > { %v1121_v47 = vpop.permute.xlu0 %1120  ;;  %v1129_v48 = vpop.permute.xlu1 %1128 }
 0x1e9   : > { %v1285_v49 = vpop.permute.xlu0 %1284  ;;  %v1131_v50 = vpop.permute.xlu1 %1130 }
 0x1ea   : > { %v1133_v51 = vsel %vm343_vm2, %v1131_v50, %v1129_v48  ;;  %v1132_v52 = vsel %vm343_vm2, %v1129_v48, %v1131_v50 }
 0x1eb   : > { %1169 = vmatprep.subr.mxu1 %v1132_v52 }
 0x1ec   : > { %2037 = vmatpush1.msk.msra.mxu1 %vm288_vm0, %v1133_v51  ;;  %vm2768_vm0 = vcmp.lt.s32.totalorder %v2359_v6, 1 }
 0x1ed   : > { %v1369_v55 = vpop.permute.xlu0 %1368  ;;  %v1123_v56 = vpop.permute.xlu1 %1122  ;;  %2038 = vmatmul.mubr.msk.f32.vlgmr.msra.gmra.mxu1 %vm352_vm6, %v314_v54  ;;  %vm2769_vm2 = vmmov %vm2768_vm0 }
 0x1ee   : > { %v1124_v57 = vsel %vm330_vm3, %v1121_v47, %v1123_v56  ;;  %v1125_v58 = vsel %vm330_vm3, %v1123_v56, %v1121_v47  ;;  %1359 = vmatprep.mubr.f32.mxu1 %v2218_v0  ;;  %vm2770_vm3 = vcmp.lt.s32.totalorder %v2359_v6, 127 }
 0x1ef   : > { %2039 = vmatprep.subr.msk.mxu0 %vm2373_vm4, %v1124_v57 }
 0x1f0   : > { %2040 = vmatpush1.msk.msra.mxu0 %vm2381_vm5, %v1125_v58  ;;  %vm2771_vm5 = vmmov %vm2770_vm3 }
 0x1f1   : > { %v1287_v60 = vpop.permute.xlu1 %1286  ;;  %2041 = vmatmul.mubr.msk.f32.vlgmr.msra.gmra.mxu0 %vm352_vm6, %v313_v59  ;;  %v1529_v3 = vpop.permute.xlu0 %1528 }
 0x1f2   : > { %v1288_v61 = vsel %vm505_vm8, %v1285_v49, %v1287_v60  ;;  %v1289_v62 = vsel %vm505_vm8, %v1287_v60, %v1285_v49  ;;  %1443 = vmatprep.mubr.f32.mxu0 %v2218_v0 }
 0x1f3   : > { %2042 = vmatprep.subr.msk.mxu1 %vm2410_vm9, %v1288_v61 }
 0x1f4   : > { %2043 = vmatpush1.msk.msra.mxu1 %vm2419_vm10, %v1289_v62 }
 0x1f5   : > { %1485 = vmatprep.subr.mxu1 %v1119_v45  ;;  %v1371_v16 = vpop.permute.xlu1 %1370  ;;  %2044 = vmatmul.mubr.msk.f32.vlgmr.msra.gmra.mxu1 %vm352_vm6, %v315_v63  ;;  %v1613_v9 = vpop.permute.xlu0 %1612 }
 0x1f6   : > { %v1372_v4 = vsel %vm2768_vm0, %v1369_v55, %v1371_v16  ;;  %v1373_v5 = vsel %vm2769_vm2, %v1371_v16, %v1369_v55  ;;  %1486 = vmatpush1.msra.mxu1 %v1118_v44  ;;  %1519 = vmatprep.mubr.f32.mxu1 %v2218_v0 }
 0x1f7   : > { %2045 = vmatprep.subr.msk.mxu0 %vm2373_vm4, %v1372_v4  ;;  %vm2772_vm4 = vcmp.lt.s32.totalorder %v2359_v6, 113 }
 0x1f8   : > { %2046 = vmatpush1.msk.msra.mxu0 %vm2367_vm1, %v1373_v5  ;;  %vm2773_vm8 = vmmov %vm2772_vm4 }
 0x1f9   : > { %v1531_v10 = vpop.permute.xlu1 %1530  ;;  %2047 = vmatmul.mubr.msk.f32.vlgmr.msra.gmra.mxu0 %vm352_vm6, %v316_v8  ;;  %2048 = vmatmul.mubr.msk.f32.vlgmr.msra.gmra.mxu1 %vm352_vm6, %v317_v27  ;;  %v1697_v24 = vpop.permute.xlu0 %1696 }
 0x1fa   : > { %v1532_v11 = vsel %vm2770_vm3, %v1529_v3, %v1531_v10  ;;  %v1533_v14 = vsel %vm2771_vm5, %v1531_v10, %v1529_v3  ;;  %1603 = vmatprep.mubr.f32.mxu0 %v2218_v0  ;;  %1687 = vmatprep.mubr.f32.mxu1 %v2218_v0 }
 0x1fb   : > { %2049 = vmatprep.subr.msk.mxu0 %vm2410_vm9, %v1533_v14 }
 0x1fc   : > { %2050 = vmatpush1.msk.msra.mxu0 %vm2385_vm7, %v1532_v11 }
 0x1fd   : > { %v1615_v15 = vpop.permute.xlu1 %1614  ;;  %2051 = vmatmul.mubr.msk.f32.vlgmr.msra.gmra.mxu0 %vm352_vm6, %v318_v13  ;;  %v1781_v12 = vpop.permute.xlu0 %1780 }
 0x1fe   : > { %v1616_v18 = vsel %vm2772_vm4, %v1613_v9, %v1615_v15  ;;  %v1617_v19 = vsel %vm2773_vm8, %v1615_v15, %v1613_v9  ;;  %1771 = vmatprep.mubr.f32.mxu0 %v2218_v0 }
 0x1ff   : > { %2052 = vmatprep.subr.msk.mxu1 %vm2478_vm15, %v1617_v19 }
 0x200   : > { %2053 = vmatpush1.msk.msra.mxu1 %vm2367_vm1, %v1616_v18 }
 0x201   : > { %v1699_v21 = vpop.permute.xlu1 %1698  ;;  %2054 = vmatmul.mubr.msk.f32.vlgmr.msra.gmra.mxu1 %vm352_vm6, %v319_v20 }
 0x202   : > { %v1700_v22 = vsel %vm937_vm12, %v1697_v24, %v1699_v21  ;;  %v1701_v23 = vsel %vm937_vm12, %v1699_v21, %v1697_v24  ;;  %1855 = vmatprep.mubr.f32.mxu1 %v2218_v0 }
 0x203   : > { %2055 = vmatprep.subr.msk.mxu0 %vm291_vm13, %v1701_v23 }
 0x204   : > { %1738 = vmatpush1.msra.mxu0 %v1700_v22 }
 0x205   : > { %v1783_v42 = vpop.permute.xlu1 %1782  ;;  %2056 = vmatmul.mubr.msk.f32.vlgmr.msra.gmra.mxu0 %vm352_vm6, %v320_v25 }
 0x206   : > { %v1784_v26 = vsel %vm1026_vm14, %v1781_v12, %v1783_v42  ;;  %v1785_v28 = vsel %vm1026_vm14, %v1783_v42, %v1781_v12 }
 0x207   : > { %2057 = vmatprep.subr.msk.mxu1 %vm2512_vm11, %v1785_v28 }
 0x208   : > { %2058 = vmatpush1.msk.msra.mxu1 %vm2385_vm7, %v1784_v26 }
 0x209   : > { %2059 = vmatmul.mubr.msk.f32.vlgmr.msra.gmra.mxu1 %vm352_vm6, %v321_v29 }
 0x20a   : > { %v1867_v59 = vpop.permute.xlu0 %1866 }
 0x2ad   : > { %v1205_v0 = vpop.f32.mrf.mxu1 }
 0x2af   : > { %v1207_v7 = vpop.f32.mrf.mxu1 }
 0x2b1   : > { %v1279_v30 = vpop.f32.mrf.mxu0 }
 0x2b2   : > { %v1280_v31 = vadd.f32 %v1279_v30, %v1205_v0 }
 0x2b3   : > { %v1281_v32 = vpop.f32.mrf.mxu0 }
 0x2b4   : > { %v1282_v33 = vadd.f32 %v1281_v32, %v1207_v7 }
 0x2b5   : > { %v1361_v6 = vpop.f32.mrf.mxu1 }
 0x2b6   : > { %v1366_v34 = vadd.f32 %v1361_v6, %v1280_v31 }
 0x2b7   : > { %v1363_v35 = vpop.f32.mrf.mxu1 }
 0x2b8   : > { %v1367_v36 = vadd.f32 %v1363_v35, %v1282_v33 }
 0x2b9   : > { %v1445_v37 = vpop.f32.mrf.mxu0  ;;  %v1521_v38 = vpop.f32.mrf.mxu1 }
 0x2ba   : > { %v1450_v53 = vadd.f32 %v1445_v37, %v1366_v34 }
 0x2bb   : > { %v1447_v39 = vpop.f32.mrf.mxu0  ;;  %v1523_v41 = vpop.f32.mrf.mxu1 }
 0x2bc   : > { %v1451_v40 = vadd.f32 %v1447_v39, %v1367_v36  ;;  %v1526_v17 = vadd.f32 %v1521_v38, %v1450_v53 }
 0x2bd   : > { %v1605_v43 = vpop.f32.mrf.mxu0 }
 0x2be   : > { %v1527_v44 = vadd.f32 %v1523_v41, %v1451_v40  ;;  %v1610_v45 = vadd.f32 %v1605_v43, %v1526_v17 }
 0x2bf   : > { %v1607_v46 = vpop.f32.mrf.mxu0 }
 0x2c0   : > { %v1611_v48 = vadd.f32 %v1607_v46, %v1527_v44 }
 0x2c1   : > { %v1689_v47 = vpop.f32.mrf.mxu1 }
 0x2c2   : > { %v1694_v49 = vadd.f32 %v1689_v47, %v1610_v45 }
 0x2c3   : > { %v1691_v50 = vpop.f32.mrf.mxu1 }
 0x2c4   : > { %v1695_v54 = vadd.f32 %v1691_v50, %v1611_v48 }
 0x2c5   : > { %v1773_v51 = vpop.f32.mrf.mxu0 }
 0x2c6   : > { %v1778_v55 = vadd.f32 %v1773_v51, %v1694_v49 }
 0x2c7   : > { %v1775_v52 = vpop.f32.mrf.mxu0 }
 0x2c8   : > { %v1779_v57 = vadd.f32 %v1775_v52, %v1695_v54 }
 0x2c9   : > { %v1857_v56 = vpop.f32.mrf.mxu1 }
 0x2ca   : > { %v1862_v58 = vadd.f32 %v1857_v56, %v1778_v55 }
 0x2cb   : > { %v1859_v60 = vpop.f32.mrf.mxu1 }
 0x2cc   : > { %v1869_v61 = vadd.f32 %v1867_v59, %v1862_v58  ;;  %v1863_v62 = vadd.f32 %v1859_v60, %v1779_v57 }
 0x2ce   : > { %v1871_v63 = vmax.f32 %v1869_v61, 0.0  ;;  %v1877_v3 = vadd.f32 %v1869_v61, %v2320_v1  ;;  %v1870_v16 = vadd.f32 %v1867_v59, %v1863_v62 }
 0x2d0   : > { %v1873_v4 = vadd.f32 %v1871_v63, %v2320_v1  ;;  %v1872_v5 = vmax.f32 %v1870_v16, 0.0  ;;  %v1878_v8 = vadd.f32 %v1870_v16, %v2326_v2  ;;  %1879 = vst [vmem:[%s255_s26] sm:$0xff] %v1877_v3 }
 0x2d2   : > { %v1874_v27 = vadd.f32 %v1872_v5, %v2326_v2  ;;  %1875 = vst [vmem:[%s2659_s29] sm:$0xff] %v1873_v4  ;;  %1880 = vst [vmem:[%s255_s26 + $0x8] sm:$0xff] %v1878_v8 }
 0x2d3   : > { %2139 = shalt.err (!%p2136_p3)
}
 0x2d4   : > { %s2140_s20 = scalar_lea.hbm %s2667_s11, 256  ;;  %s2144_s12 = scalar_lea.hbm %s2746_s6, 512 }
 0x2d5   : > { %p2141_p4 = scmp.ne.s32.totalorder %s2667_s11, %s2140_s20  ;;  %p2145_p9 = scmp.lt.s32.totalorder %s2667_s11, %s2746_s6 }
 0x2d6   : > { %p2146_p10 = scmp.lt.s32.totalorder %s2144_s12, %s2140_s20 }
 0x2d7   : > { %p2142_p7 = pnand %p2141_p4, %p2303_p5 }
 0x2d8   : > { %p2147_p11 = por %p2146_p10, %p2145_p9 }
 0x2d9   : > { %p2143_p8 = pneg %p2142_p7 }
 0x2db   : > { %p2148_p12 = pnand %p2147_p11, %p2143_p8 }
 0x2dd   : > { %2151 = shalt.err (!%p2148_p12)
}
 0x2de   : > { %2072 = dma.vmem_to_hbm [thread:$0]  (%p2303_p5), %s2669_s28, 256, %s2667_s11, %s1887_s14   ;;  %1876 = vst [vmem:[%s2659_s29 + $0x8] sm:$0xff] %v1874_v27 }
 0x2df   : > { %s1882_s16 = scalar_lea.sflag [#allocation3], %s2654_s18  ;;  %s2152_s19 = scalar_lea.vmem %s2678_s9, 256 }
 0x2e0   : > { %p2153_p13 = scmp.ne.s32.totalorder %s2678_s9, %s2152_s19  ;;  %s2229_s25 = smov [#allocation2]  }
 0x2e1   : > { %s2156_s20 = sshll.u32 %s2229_s25, 4  ;;  %s2157_s20 = int_to_ptr.vmem [resolvable:$false] %s2156_s20 }
 0x2e2   : > { %p2154_p0 = pnand %p2153_p13, %p2303_p5  ;;  %s2158_s26 = scalar_lea.vmem %s2157_s20, 512 }
 0x2e3   : > { %p2159_p2 = scmp.lt.s32.totalorder %s2678_s9, %s2157_s20  ;;  %p2160_p3 = scmp.lt.s32.totalorder %s2158_s26, %s2152_s19 }
 0x2e4   : > { %p2155_p1 = pneg %p2154_p0 }
 0x2e5   : > { %p2161_p4 = por %p2160_p3, %p2159_p2 }
 0x2e7   : > { %p2162_p7 = pnand %p2161_p4, %p2155_p1 }
 0x2e9   : > { %2165 = shalt.err (!%p2162_p7)
}
 0x2ea   : > { %s2166_s28 = scalar_lea.hbm %s2676_s13, 256  ;;  %s2170_s11 = scalar_lea.hbm %s2745_s5, 512 }
 0x2eb   : > { %p2167_p8 = scmp.ne.s32.totalorder %s2676_s13, %s2166_s28  ;;  %p2171_p11 = scmp.lt.s32.totalorder %s2676_s13, %s2745_s5 }
 0x2ec   : > { %p2172_p12 = scmp.lt.s32.totalorder %s2170_s11, %s2166_s28 }
 0x2ed   : > { %p2168_p9 = pnand %p2167_p8, %p2303_p5 }
 0x2ee   : > { %p2173_p13 = por %p2172_p12, %p2171_p11 }
 0x2ef   : > { %p2169_p10 = pneg %p2168_p9 }
 0x2f1   : > { %p2174_p0 = pnand %p2173_p13, %p2169_p10 }
 0x2f3   : > { %2177 = shalt.err (!%p2174_p0)
}
 0x2f4   : > { %2071 = dma.vmem_to_hbm [thread:$0]  (%p2303_p5), %s2678_s9, 256, %s2676_s13, %s1882_s16  }
 0x2f5 PF: > { %p2082_p1 = scmp.ge.s32.totalorder %s2216_s24, 2  ;;  %s1927_s12 = sand.u32 1, %s2204_s21  }
 0x2f6   : > { %s1928_s15 = scalar_lea.sflag [#allocation3], %s1927_s12 }
 0x2f7   : > { %p2076_p2 = pnand %p2082_p1, %p2307_p6 }
 0x2f9   : > { %p2077_p3 = pneg %p2076_p2 }
 0x2fb   : > { %2195 = dma.done.wait (%p2077_p3), %s1928_s15, 256  }
 0x2fc   : > { %2197 = vsyncadd (%p2077_p3), %s1928_s15, 4294967040  ;;  %s1937_s17 = scalar_lea.sflag [#allocation5], %s1927_s12 }
 0x2fd   : > { %2199 = dma.done.wait (%p2077_p3), %s1937_s17, 256  }
 0x2fe   : > { %2201 = vsyncadd (%p2077_p3), %s1937_s17, 4294967040  ;;  %p20_p5 = scmp.ge.s32.totalorder %s2290_s27, 4   ;;  %s2774_s21 = smov %s2208_s22 }
 0x2ff   : > { %s2775_s22 = smov %s2212_s23  ;;  %s2776_s23 = smov %s2301_s30 }
 0x300   : > { %s2777_s24 = smov %s2290_s27  ;;  %22 = sbr.rel (!%p20_p5) target bundleno = 5 (0x5), region = 92 }
 0x305   :  { %1942 = vsyncpa [#allocation3], 1 }
 0x306   :  { %1944 = vsyncpa [#allocation3 + $0x1], 1 }
 0x307   :  { %1945 = vsyncpa [#allocation5], 1 }
 0x308   :  { %1947 = vsyncpa [#allocation5 + $0x1], 1 }

</bundles_post_ra>
